<compile_context>
chip_gen: v7x
topology: tpu7x:2x2x1
jax: 0.10.0
libtpu: 0.0.40
codegen_flags: <defaults>
</compile_context>

<pallas_src>
import functools

import jax
import jax.numpy as jnp
from jax.experimental import pallas as pl
from jax.experimental.pallas import tpu as pltpu


def _round_up(v: int, m: int) -> int:
    return ((v + m - 1) // m) * m


def _cdiv(a: int, b: int) -> int:
    return -(-a // b)


def _vmem_budget_bytes() -> int:
    """Usable VMEM for this generation: physical capacity minus headroom."""
    try:
        cap = int(pltpu.get_tpu_info().vmem_capacity_bytes)  # 64 MiB v7x, 128 MiB v5e/v6e
    except Exception:
        cap = 64 * 1024 * 1024  # conservative default
    return max(cap - 16 * 1024 * 1024, 32 * 1024 * 1024)


# ----------------------------- fused (resident) path ------------------------


def _fused_mlp_kernel(x_ref, *refs, n_layers: int):
    """One batch tile of the whole MLP.

    refs = (w_0..w_{L-1}, b_0..b_{L-1}, out_ref). Weights are bf16 MXU inputs
    with f32 accumulation; bias-add/ReLU run in f32 (v5e has no bf16 VALU); the
    live inter-layer activation is carried in bf16 to halve vreg pressure.
    """
    w_refs = refs[:n_layers]
    b_refs = refs[n_layers:2 * n_layers]
    o_ref = refs[2 * n_layers]

    h = x_ref[...]  # bf16 [bm, D0_pad]
    for i in range(n_layers):
        y = jnp.dot(h, w_refs[i][...], preferred_element_type=jnp.float32)
        y = y + b_refs[i][...]                      # f32 bias, [1, N_pad] broadcast
        if i < n_layers - 1:
            h = jnp.maximum(y, 0.0).astype(jnp.bfloat16)  # bf16 inter-layer act
        else:
            h = y
    o_ref[...] = h.astype(o_ref.dtype)


# --------------------------- streaming fallback path ------------------------


def _linear_kernel(x_ref, w_ref, b_ref, o_ref, acc_ref, *, apply_relu: bool):
    """Tiled y = relu?(x @ W + b): grid (M, N, K), f32 accumulator in VMEM."""
    @pl.when(pl.program_id(2) == 0)
    def _():
        acc_ref[...] = jnp.zeros_like(acc_ref)

    acc_ref[...] += jnp.dot(x_ref[...], w_ref[...],
                            preferred_element_type=jnp.float32)

    @pl.when(pl.program_id(2) == pl.num_programs(2) - 1)
    def _():
        y = acc_ref[...] + b_ref[...]
        if apply_relu:
            y = jnp.maximum(y, 0.0)
        o_ref[...] = y.astype(o_ref.dtype)


def _linear_layer_pallas(x, w, b, *, apply_relu, out_dtype, vmem_limit):
    """One Linear(+ReLU) layer as a tiled Pallas matmul (streaming weights)."""
    M, K = x.shape
    N = w.shape[1]

    mt = max(1, _cdiv(M, 256))
    bm = _round_up(_cdiv(M, mt), 16)
    m_pad = mt * bm

    nt = max(1, _cdiv(N, 512))
    bn = _round_up(_cdiv(N, nt), 128)
    n_pad = nt * bn

    kt = max(1, _cdiv(K, 512))
    bk = _round_up(_cdiv(K, kt), 128 if kt > 1 else 16)
    k_pad = kt * bk

    x_p = (jnp.zeros((m_pad, k_pad), jnp.bfloat16)
           .at[:M, :K].set(x.astype(jnp.bfloat16)))
    w_p = (jnp.zeros((k_pad, n_pad), jnp.bfloat16)
           .at[:K, :N].set(w.astype(jnp.bfloat16)))
    b_p = (jnp.zeros((1, n_pad), jnp.float32)
           .at[0, :N].set(b.astype(jnp.float32)))

    out_p = pl.pallas_call(
        functools.partial(_linear_kernel, apply_relu=apply_relu),
        out_shape=jax.ShapeDtypeStruct((m_pad, n_pad), out_dtype),
        grid=(mt, nt, kt),
        in_specs=[pl.BlockSpec((bm, bk), lambda i, j, k: (i, k)),
                  pl.BlockSpec((bk, bn), lambda i, j, k: (k, j)),
                  pl.BlockSpec((1, bn), lambda i, j, k: (0, j))],
        out_specs=pl.BlockSpec((bm, bn), lambda i, j, k: (i, j)),
        scratch_shapes=[pltpu.VMEM((bm, bn), jnp.float32)],
        compiler_params=pltpu.CompilerParams(
            dimension_semantics=("parallel", "parallel", "arbitrary"),
            vmem_limit_bytes=vmem_limit),
    )(x_p, w_p, b_p)
    return out_p[:M, :N]


# --------------------------------- wrapper -----------------------------------


def fnn_forward_pallas(params, x, *, block_batch: int = 1024, lane: int = 128,
                       force_streaming: bool = False):
    """params: list of (W [Din, Dout] f32, b [Dout] f32). x: [B, input_size].

    Equivalent to torch's stacked nn.Linear/ReLU with W = weight.T.
    """
    B, d_in = x.shape
    n_layers = len(params)
    out_size = params[-1][0].shape[1]

    budget = _vmem_budget_bytes()

    # Feature padding: input dim only to the bf16 sublane multiple (16); all
    # lane (output) dims to 128 for lane-dense stores / full MXU columns.
    sizes = [d_in] + [w.shape[1] for w, _ in params]
    sizes_pad = [_round_up(sizes[0], 16)] + [_round_up(s, lane) for s in sizes[1:]]

    bytes_resident = sum(sizes_pad[i] * sizes_pad[i + 1] * 2   # bf16 weights
                         + sizes_pad[i + 1] * 4                # f32 biases
                         for i in range(n_layers))

    def tile_bytes(bm):
        act = bm * max(sizes_pad) * 6            # live f32 + bf16 activation copies
        xin = 2 * bm * sizes_pad[0] * 2          # double-buffered bf16 x tile
        out = 2 * bm * sizes_pad[-1] * 4         # double-buffered f32 out tile
        return act + xin + out

    use_fused = (not force_streaming) and (bytes_resident <= 0.6 * budget)

    if not use_fused:
        # Weights too large to keep VMEM-resident: per-layer tiled kernels,
        # bf16 activations round-trip HBM between layers.
        h = x
        for i, (w, b) in enumerate(params):
            last = (i == n_layers - 1)
            h = _linear_layer_pallas(
                h, w, b, apply_relu=not last,
                out_dtype=(x.dtype if last else jnp.bfloat16),
                vmem_limit=budget)
        return h

    # Balanced batch tiling: minimise padding, >=2 tiles for megacore when the
    # batch is large enough, shrink tiles if VMEM would overflow.
    n_tiles = max(1, _cdiv(B, block_batch))
    if n_tiles == 1 and B >= 64:
        n_tiles = 2  # v7x: let the "parallel" axis span both TensorCores
    while True:
        bm = _round_up(_cdiv(B, n_tiles), 16)
        if bytes_resident + tile_bytes(bm) <= budget or bm <= 64:
            break
        n_tiles *= 2
    b_pad = n_tiles * bm
    grid = (n_tiles,)

    # Host-side packing: x streams as bf16, weights bf16, biases f32.
    x_p = (jnp.zeros((b_pad, sizes_pad[0]), jnp.bfloat16)
           .at[:B, :d_in].set(x.astype(jnp.bfloat16)))
    ws_p, bs_p = [], []
    for i, (w, b) in enumerate(params):
        kp, np_ = sizes_pad[i], sizes_pad[i + 1]
        ws_p.append(jnp.zeros((kp, np_), jnp.bfloat16)
                    .at[:w.shape[0], :w.shape[1]].set(w.astype(jnp.bfloat16)))
        bs_p.append(jnp.zeros((1, np_), jnp.float32)
                    .at[0, :b.shape[0]].set(b.astype(jnp.float32)))

    def run(single_buffer_resident: bool):
        res_kwargs = ({"pipeline_mode": pl.Buffered(1)}
                      if single_buffer_resident else {})
        in_specs = (
            [pl.BlockSpec((bm, sizes_pad[0]), lambda i: (i, 0))]
            + [pl.BlockSpec(w.shape, lambda i: (0, 0), **res_kwargs) for w in ws_p]
            + [pl.BlockSpec(b.shape, lambda i: (0, 0), **res_kwargs) for b in bs_p]
        )
        out_spec = pl.BlockSpec((bm, sizes_pad[-1]), lambda i: (i, 0))
        return pl.pallas_call(
            functools.partial(_fused_mlp_kernel, n_layers=n_layers),
            out_shape=jax.ShapeDtypeStruct((b_pad, sizes_pad[-1]), x.dtype),
            grid=grid,
            in_specs=in_specs,
            out_specs=out_spec,
            compiler_params=pltpu.CompilerParams(
                dimension_semantics=("parallel",),
                vmem_limit_bytes=budget),
        )(x_p, *ws_p, *bs_p)

    try:
        out_p = run(True)    # resident weights, single-buffered
    except Exception:
        out_p = run(False)   # fallback if pl.Buffered(1) is not supported
    return out_p[:B, :out_size]


def init_fnn_params(key, input_size, hidden_nodes, output_size):
    """Deterministic init mirroring the nn.Linear layer shapes in FNN.__init__."""
    sizes = [input_size] + list(hidden_nodes) + [output_size]
    params = []
    for i in range(len(sizes) - 1):
        fan_in, fan_out = sizes[i], sizes[i + 1]
        key, kw, kb = jax.random.split(key, 3)
        bound = 1.0 / (fan_in ** 0.5)  # same scale as torch's default uniform init
        w = jax.random.uniform(kw, (fan_in, fan_out), jnp.float32, -bound, bound)
        b = jax.random.uniform(kb, (fan_out,), jnp.float32, -bound, bound)
        params.append((w, b))
    return params


if __name__ == "__main__":
    # Small shapes consistent with the module: x is [batch, input_size].
    batch = 8
    input_size = 32
    hidden_nodes = [64, 32]
    output_size = 16

    key = jax.random.PRNGKey(0)
    key, kx = jax.random.split(key)
    x = jax.random.normal(kx, (batch, input_size), jnp.float32)
    params = init_fnn_params(key, input_size, hidden_nodes, output_size)

    # Fused (VMEM-resident) path.
    out = jax.block_until_ready(fnn_forward_pallas(params, x))
    assert out.shape == (batch, output_size)

    # Reference 1: same precision path (bf16 matmul inputs, f32 accumulation).
    ref = x
    for i, (w, b) in enumerate(params):
        ref = jnp.dot(ref.astype(jnp.bfloat16), w.astype(jnp.bfloat16),
                      preferred_element_type=jnp.float32) + b
        if i < len(params) - 1:
            ref = jnp.maximum(ref, 0.0)
    assert jnp.allclose(out, ref, atol=2e-3, rtol=2e-3), "fused path mismatch"

    # Streaming fallback path (per-layer tiled kernels) — exercised explicitly.
    out_s = jax.block_until_ready(fnn_forward_pallas(params, x, force_streaming=True))
    assert out_s.shape == (batch, output_size)
    assert jnp.allclose(out_s, ref, atol=1e-2, rtol=1e-2), "streaming path mismatch"

    # Reference 2: pure f32 path, loose tolerance (bf16 quantisation of inputs/weights).
    ref32 = x
    for i, (w, b) in enumerate(params):
        ref32 = ref32 @ w + b
        if i < len(params) - 1:
            ref32 = jnp.maximum(ref32, 0.0)
    assert jnp.allclose(out, ref32, atol=1e-1, rtol=1e-1)

    print("KERNEL_OK")
</pallas_src>

<mosaic_0001>
module attributes {stable_mosaic.version = 11 : i64} {
  func.func @_fused_mlp_kernel(%arg0: i32, %arg1: memref<16x32xbf16, #tpu.memory_space<vmem>>, %arg2: memref<32x128xbf16, #tpu.memory_space<vmem>>, %arg3: memref<128x128xbf16, #tpu.memory_space<vmem>>, %arg4: memref<128x128xbf16, #tpu.memory_space<vmem>>, %arg5: memref<1x128xf32, #tpu.memory_space<vmem>>, %arg6: memref<1x128xf32, #tpu.memory_space<vmem>>, %arg7: memref<1x128xf32, #tpu.memory_space<vmem>>, %arg8: memref<16x128xf32, #tpu.memory_space<vmem>>) attributes {dimension_semantics = [#tpu.dimension_semantics<parallel>], iteration_bounds = array<i64: 1>, scalar_prefetch = 0 : i64, scratch_operands = 0 : i64, tpu.core_type = #tpu.core_type<tc>, window_params = [{transform_indices = @transform_0, window_bounds = array<i64: 16, 32>}, {pipeline_mode = #tpu.pipeline_mode<synchronous>, transform_indices = @transform_1, window_bounds = array<i64: 32, 128>}, {pipeline_mode = #tpu.pipeline_mode<synchronous>, transform_indices = @transform_2, window_bounds = array<i64: 128, 128>}, {pipeline_mode = #tpu.pipeline_mode<synchronous>, transform_indices = @transform_3, window_bounds = array<i64: 128, 128>}, {pipeline_mode = #tpu.pipeline_mode<synchronous>, transform_indices = @transform_4, window_bounds = array<i64: 1, 128>}, {pipeline_mode = #tpu.pipeline_mode<synchronous>, transform_indices = @transform_5, window_bounds = array<i64: 1, 128>}, {pipeline_mode = #tpu.pipeline_mode<synchronous>, transform_indices = @transform_6, window_bounds = array<i64: 1, 128>}, {transform_indices = @transform_7, window_bounds = array<i64: 16, 128>}]} {
    %c0 = arith.constant 0 : index
    %c0_0 = arith.constant 0 : index
    %0 = vector.load %arg1[%c0, %c0_0] : memref<16x32xbf16, #tpu.memory_space<vmem>>, vector<16x32xbf16>
    %c0_1 = arith.constant 0 : index
    %c0_2 = arith.constant 0 : index
    %1 = vector.load %arg2[%c0_1, %c0_2] : memref<32x128xbf16, #tpu.memory_space<vmem>>, vector<32x128xbf16>
    %cst = arith.constant dense<0.000000e+00> : vector<16x128xf32>
    %2 = tpu.matmul %0, %1, %cst {dimension_numbers = #tpu.dot_dimension_numbers<[1], [0], [0], [1], [0, 0, 1, 1], [], []>} : vector<16x32xbf16>, vector<32x128xbf16>, vector<16x128xf32> -> vector<16x128xf32>
    %c0_3 = arith.constant 0 : index
    %c0_4 = arith.constant 0 : index
    %3 = vector.load %arg5[%c0_3, %c0_4] : memref<1x128xf32, #tpu.memory_space<vmem>>, vector<1x128xf32>
    %4 = vector.broadcast %3 : vector<1x128xf32> to vector<16x128xf32>
    %5 = arith.addf %2, %4 : vector<16x128xf32>
    %cst_5 = arith.constant 0.000000e+00 : f32
    %6 = vector.broadcast %cst_5 : f32 to vector<16x128xf32>
    %7 = arith.maximumf %5, %6 : vector<16x128xf32>
    %8 = arith.truncf %7 : vector<16x128xf32> to vector<16x128xbf16>
    %c0_6 = arith.constant 0 : index
    %c0_7 = arith.constant 0 : index
    %9 = vector.load %arg3[%c0_6, %c0_7] : memref<128x128xbf16, #tpu.memory_space<vmem>>, vector<128x128xbf16>
    %cst_8 = arith.constant dense<0.000000e+00> : vector<16x128xf32>
    %10 = tpu.matmul %8, %9, %cst_8 {dimension_numbers = #tpu.dot_dimension_numbers<[1], [0], [0], [1], [0, 0, 1, 1], [], []>} : vector<16x128xbf16>, vector<128x128xbf16>, vector<16x128xf32> -> vector<16x128xf32>
    %c0_9 = arith.constant 0 : index
    %c0_10 = arith.constant 0 : index
    %11 = vector.load %arg6[%c0_9, %c0_10] : memref<1x128xf32, #tpu.memory_space<vmem>>, vector<1x128xf32>
    %12 = vector.broadcast %11 : vector<1x128xf32> to vector<16x128xf32>
    %13 = arith.addf %10, %12 : vector<16x128xf32>
    %cst_11 = arith.constant 0.000000e+00 : f32
    %14 = vector.broadcast %cst_11 : f32 to vector<16x128xf32>
    %15 = arith.maximumf %13, %14 : vector<16x128xf32>
    %16 = arith.truncf %15 : vector<16x128xf32> to vector<16x128xbf16>
    %c0_12 = arith.constant 0 : index
    %c0_13 = arith.constant 0 : index
    %17 = vector.load %arg4[%c0_12, %c0_13] : memref<128x128xbf16, #tpu.memory_space<vmem>>, vector<128x128xbf16>
    %cst_14 = arith.constant dense<0.000000e+00> : vector<16x128xf32>
    %18 = tpu.matmul %16, %17, %cst_14 {dimension_numbers = #tpu.dot_dimension_numbers<[1], [0], [0], [1], [0, 0, 1, 1], [], []>} : vector<16x128xbf16>, vector<128x128xbf16>, vector<16x128xf32> -> vector<16x128xf32>
    %c0_15 = arith.constant 0 : index
    %c0_16 = arith.constant 0 : index
    %19 = vector.load %arg7[%c0_15, %c0_16] : memref<1x128xf32, #tpu.memory_space<vmem>>, vector<1x128xf32>
    %20 = vector.broadcast %19 : vector<1x128xf32> to vector<16x128xf32>
    %21 = arith.addf %18, %20 : vector<16x128xf32>
    %c0_17 = arith.constant 0 : index
    %c0_18 = arith.constant 0 : index
    %22 = vector.load %arg8[%c0_17, %c0_18] : memref<16x128xf32, #tpu.memory_space<vmem>>, vector<16x128xf32>
    tpu.vector_store %arg8[%c0_17, %c0_18], %21 {strides = array<i32>} : memref<16x128xf32, #tpu.memory_space<vmem>>, vector<16x128xf32>,
    return
  }
  func.func @transform_0(%arg0: i32) -> (i32, i32) {
    %c0_i32 = arith.constant 0 : i32
    %c0_i32_0 = arith.constant 0 : i32
    return %arg0, %c0_i32 : i32, i32
  }
  func.func @transform_1(%arg0: i32) -> (i32, i32) {
    %c0_i32 = arith.constant 0 : i32
    %c0_i32_0 = arith.constant 0 : i32
    %c0_i32_1 = arith.constant 0 : i32
    return %c0_i32, %c0_i32_0 : i32, i32
  }
  func.func @transform_2(%arg0: i32) -> (i32, i32) {
    %c0_i32 = arith.constant 0 : i32
    %c0_i32_0 = arith.constant 0 : i32
    %c0_i32_1 = arith.constant 0 : i32
    return %c0_i32, %c0_i32_0 : i32, i32
  }
  func.func @transform_3(%arg0: i32) -> (i32, i32) {
    %c0_i32 = arith.constant 0 : i32
    %c0_i32_0 = arith.constant 0 : i32
    %c0_i32_1 = arith.constant 0 : i32
    return %c0_i32, %c0_i32_0 : i32, i32
  }
  func.func @transform_4(%arg0: i32) -> (i32, i32) {
    %c0_i32 = arith.constant 0 : i32
    %c0_i32_0 = arith.constant 0 : i32
    %c0_i32_1 = arith.constant 0 : i32
    return %c0_i32, %c0_i32_0 : i32, i32
  }
  func.func @transform_5(%arg0: i32) -> (i32, i32) {
    %c0_i32 = arith.constant 0 : i32
    %c0_i32_0 = arith.constant 0 : i32
    %c0_i32_1 = arith.constant 0 : i32
    return %c0_i32, %c0_i32_0 : i32, i32
  }
  func.func @transform_6(%arg0: i32) -> (i32, i32) {
    %c0_i32 = arith.constant 0 : i32
    %c0_i32_0 = arith.constant 0 : i32
    %c0_i32_1 = arith.constant 0 : i32
    return %c0_i32, %c0_i32_0 : i32, i32
  }
  func.func @transform_7(%arg0: i32) -> (i32, i32) {
    %c0_i32 = arith.constant 0 : i32
    %c0_i32_0 = arith.constant 0 : i32
    return %arg0, %c0_i32 : i32, i32
  }
}

module attributes {stable_mosaic.version = 11 : i64} {
  func.func @_fused_mlp_kernel(%arg0: i32, %arg1: memref<16x32xbf16, #tpu.memory_space<vmem>>, %arg2: memref<32x128xbf16, #tpu.memory_space<vmem>>, %arg3: memref<128x128xbf16, #tpu.memory_space<vmem>>, %arg4: memref<128x128xbf16, #tpu.memory_space<vmem>>, %arg5: memref<1x128xf32, #tpu.memory_space<vmem>>, %arg6: memref<1x128xf32, #tpu.memory_space<vmem>>, %arg7: memref<1x128xf32, #tpu.memory_space<vmem>>, %arg8: memref<16x128xf32, #tpu.memory_space<vmem>>) attributes {dimension_semantics = [#tpu.dimension_semantics<parallel>], iteration_bounds = array<i64: 1>, scalar_prefetch = 0 : i64, scratch_operands = 0 : i64, tpu.core_type = #tpu.core_type<tc>, window_params = [{transform_indices = @transform_0, window_bounds = array<i64: 16, 32>}, {pipeline_mode = #tpu.pipeline_mode<synchronous>, transform_indices = @transform_1, window_bounds = array<i64: 32, 128>}, {pipeline_mode = #tpu.pipeline_mode<synchronous>, transform_indices = @transform_2, window_bounds = array<i64: 128, 128>}, {pipeline_mode = #tpu.pipeline_mode<synchronous>, transform_indices = @transform_3, window_bounds = array<i64: 128, 128>}, {pipeline_mode = #tpu.pipeline_mode<synchronous>, transform_indices = @transform_4, window_bounds = array<i64: 1, 128>}, {pipeline_mode = #tpu.pipeline_mode<synchronous>, transform_indices = @transform_5, window_bounds = array<i64: 1, 128>}, {pipeline_mode = #tpu.pipeline_mode<synchronous>, transform_indices = @transform_6, window_bounds = array<i64: 1, 128>}, {transform_indices = @transform_7, window_bounds = array<i64: 16, 128>}]} {
    %c0 = arith.constant 0 : index
    %c0_0 = arith.constant 0 : index
    %0 = vector.load %arg1[%c0, %c0_0] : memref<16x32xbf16, #tpu.memory_space<vmem>>, vector<16x32xbf16>
    %c0_1 = arith.constant 0 : index
    %c0_2 = arith.constant 0 : index
    %1 = vector.load %arg2[%c0_1, %c0_2] : memref<32x128xbf16, #tpu.memory_space<vmem>>, vector<32x128xbf16>
    %cst = arith.constant dense<0.000000e+00> : vector<16x128xf32>
    %2 = tpu.matmul %0, %1, %cst {dimension_numbers = #tpu.dot_dimension_numbers<[1], [0], [0], [1], [0, 0, 1, 1], [], []>} : vector<16x32xbf16>, vector<32x128xbf16>, vector<16x128xf32> -> vector<16x128xf32>
    %c0_3 = arith.constant 0 : index
    %c0_4 = arith.constant 0 : index
    %3 = vector.load %arg5[%c0_3, %c0_4] : memref<1x128xf32, #tpu.memory_space<vmem>>, vector<1x128xf32>
    %4 = vector.broadcast %3 : vector<1x128xf32> to vector<16x128xf32>
    %5 = arith.addf %2, %4 : vector<16x128xf32>
    %cst_5 = arith.constant 0.000000e+00 : f32
    %6 = vector.broadcast %cst_5 : f32 to vector<16x128xf32>
    %7 = arith.maximumf %5, %6 : vector<16x128xf32>
    %8 = arith.truncf %7 : vector<16x128xf32> to vector<16x128xbf16>
    %c0_6 = arith.constant 0 : index
    %c0_7 = arith.constant 0 : index
    %9 = vector.load %arg3[%c0_6, %c0_7] : memref<128x128xbf16, #tpu.memory_space<vmem>>, vector<128x128xbf16>
    %cst_8 = arith.constant dense<0.000000e+00> : vector<16x128xf32>
    %10 = tpu.matmul %8, %9, %cst_8 {dimension_numbers = #tpu.dot_dimension_numbers<[1], [0], [0], [1], [0, 0, 1, 1], [], []>} : vector<16x128xbf16>, vector<128x128xbf16>, vector<16x128xf32> -> vector<16x128xf32>
    %c0_9 = arith.constant 0 : index
    %c0_10 = arith.constant 0 : index
    %11 = vector.load %arg6[%c0_9, %c0_10] : memref<1x128xf32, #tpu.memory_space<vmem>>, vector<1x128xf32>
    %12 = vector.broadcast %11 : vector<1x128xf32> to vector<16x128xf32>
    %13 = arith.addf %10, %12 : vector<16x128xf32>
    %cst_11 = arith.constant 0.000000e+00 : f32
    %14 = vector.broadcast %cst_11 : f32 to vector<16x128xf32>
    %15 = arith.maximumf %13, %14 : vector<16x128xf32>
    %16 = arith.truncf %15 : vector<16x128xf32> to vector<16x128xbf16>
    %c0_12 = arith.constant 0 : index
    %c0_13 = arith.constant 0 : index
    %17 = vector.load %arg4[%c0_12, %c0_13] : memref<128x128xbf16, #tpu.memory_space<vmem>>, vector<128x128xbf16>
    %cst_14 = arith.constant dense<0.000000e+00> : vector<16x128xf32>
    %18 = tpu.matmul %16, %17, %cst_14 {dimension_numbers = #tpu.dot_dimension_numbers<[1], [0], [0], [1], [0, 0, 1, 1], [], []>} : vector<16x128xbf16>, vector<128x128xbf16>, vector<16x128xf32> -> vector<16x128xf32>
    %c0_15 = arith.constant 0 : index
    %c0_16 = arith.constant 0 : index
    %19 = vector.load %arg7[%c0_15, %c0_16] : memref<1x128xf32, #tpu.memory_space<vmem>>, vector<1x128xf32>
    %20 = vector.broadcast %19 : vector<1x128xf32> to vector<16x128xf32>
    %21 = arith.addf %18, %20 : vector<16x128xf32>
    %c0_17 = arith.constant 0 : index
    %c0_18 = arith.constant 0 : index
    %22 = vector.load %arg8[%c0_17, %c0_18] : memref<16x128xf32, #tpu.memory_space<vmem>>, vector<16x128xf32>
    tpu.vector_store %arg8[%c0_17, %c0_18], %21 {strides = array<i32>} : memref<16x128xf32, #tpu.memory_space<vmem>>, vector<16x128xf32>,
    return
  }
  func.func @transform_0(%arg0: i32) -> (i32, i32) {
    %c0_i32 = arith.constant 0 : i32
    %c0_i32_0 = arith.constant 0 : i32
    return %arg0, %c0_i32 : i32, i32
  }
  func.func @transform_1(%arg0: i32) -> (i32, i32) {
    %c0_i32 = arith.constant 0 : i32
    %c0_i32_0 = arith.constant 0 : i32
    %c0_i32_1 = arith.constant 0 : i32
    return %c0_i32, %c0_i32_0 : i32, i32
  }
  func.func @transform_2(%arg0: i32) -> (i32, i32) {
    %c0_i32 = arith.constant 0 : i32
    %c0_i32_0 = arith.constant 0 : i32
    %c0_i32_1 = arith.constant 0 : i32
    return %c0_i32, %c0_i32_0 : i32, i32
  }
  func.func @transform_3(%arg0: i32) -> (i32, i32) {
    %c0_i32 = arith.constant 0 : i32
    %c0_i32_0 = arith.constant 0 : i32
    %c0_i32_1 = arith.constant 0 : i32
    return %c0_i32, %c0_i32_0 : i32, i32
  }
  func.func @transform_4(%arg0: i32) -> (i32, i32) {
    %c0_i32 = arith.constant 0 : i32
    %c0_i32_0 = arith.constant 0 : i32
    %c0_i32_1 = arith.constant 0 : i32
    return %c0_i32, %c0_i32_0 : i32, i32
  }
  func.func @transform_5(%arg0: i32) -> (i32, i32) {
    %c0_i32 = arith.constant 0 : i32
    %c0_i32_0 = arith.constant 0 : i32
    %c0_i32_1 = arith.constant 0 : i32
    return %c0_i32, %c0_i32_0 : i32, i32
  }
  func.func @transform_6(%arg0: i32) -> (i32, i32) {
    %c0_i32 = arith.constant 0 : i32
    %c0_i32_0 = arith.constant 0 : i32
    %c0_i32_1 = arith.constant 0 : i32
    return %c0_i32, %c0_i32_0 : i32, i32
  }
  func.func @transform_7(%arg0: i32) -> (i32, i32) {
    %c0_i32 = arith.constant 0 : i32
    %c0_i32_0 = arith.constant 0 : i32
    return %arg0, %c0_i32 : i32, i32
  }
}

</mosaic_0001>

<bundles_post_ra>
// kernel: tpu_custom_call.1
= control target key start
LH: loop header
LB: loop body
LE: loop exit
PB: predicated region body
PF: predicated region fallthrough
CT: control target
= control target key end

     0   :  { %12 = vsyncpa [#allocation3], 0  ;;  %s819_s0 = inlined_call_operand.hbm [shape: bf16[16,32], index: 0, kind: input, shape index: {}]   ;;  %s820_s1 = inlined_call_operand.hbm [shape: bf16[32,128], index: 1, kind: input, shape index: {}]   ;;  %s821_s2 = inlined_call_operand.hbm [shape: bf16[128,128], index: 2, kind: input, shape index: {}]   ;;  %s822_s3 = inlined_call_operand.hbm [shape: bf16[128,128], index: 3, kind: input, shape index: {}]   ;;  %s823_s4 = inlined_call_operand.vmem [shape: f32[1,128], index: 4, kind: input, shape index: {}]   ;;  %s824_s5 = inlined_call_operand.vmem [shape: f32[1,128], index: 5, kind: input, shape index: {}]   ;;  %s825_s6 = inlined_call_operand.vmem [shape: f32[1,128], index: 6, kind: input, shape index: {}]   ;;  %s826_s7 = inlined_call_operand.hbm [shape: f32[16,128], index: 7, kind: output, shape index: {}]  }
   0x1   :  { %13 = vsyncpa [#allocation6], 0 }
   0x2   :  { %14 = vsyncpa [#allocation9], 0 }
   0x3   :  { %15 = vsyncpa [#allocation4], 0  ;;  %s649_s24 = smov [#allocation5]   ;;  %s650_s26 = smov [#allocation2]  }
   0x4   :  { %s33_s25 = sshll.u32 %s649_s24, 4  ;;  %s21_s27 = sshll.u32 %s650_s26, 4  ;;  %s34_s25 = int_to_ptr.vmem [resolvable:$true] %s33_s25  ;;  %s700_s27 = int_to_ptr.vmem [resolvable:$true] %s21_s27 }
   0x5   :  { %s531_s30 = scalar_lea.hbm %s820_s1, 256 }
   0x6   :  { %p532_p0 = scmp.ne.s32.totalorder %s820_s1, %s531_s30  ;;  %p535_p1 = scmp.lt.u32.totalorder %s531_s30, %s820_s1 }
   0x8   :  { %p537_p2 = pnand %p535_p1, %p532_p0 }
   0xa   :  { %540 = shalt.err (!%p537_p2)
}
   0xb   :  { %s541_s12 = scalar_lea.vmem %s34_s25, 256  ;;  %p546_p4 = scmp.lt.s32.totalorder %s34_s25, %s34_s25 }
   0xc   :  { %p542_p3 = scmp.ne.s32.totalorder %s34_s25, %s541_s12  ;;  %p547_p5 = scmp.lt.s32.totalorder %s541_s12, %s541_s12 }
   0xe   :  { %p548_p6 = por %p547_p5, %p546_p4 }
  0x10   :  { %p549_p7 = pnand %p548_p6, %p542_p3 }
  0x12   :  { %552 = shalt.err (!%p549_p7)
}
  0x13   :  { %s651_s13 = smov 64   ;;  %s652_s14 = smov 4  }
  0x14   :  { %39 = dma.hbm_to_vmem [thread:$0]  %s820_s1, 256, %s34_s25, [#allocation6], %s651_s13, %s651_s13, %s652_s14  }
  0x15   :  { %s553_s19 = scalar_lea.hbm %s819_s0, 128 }
  0x16   :  { %p554_p8 = scmp.ne.s32.totalorder %s819_s0, %s553_s19  ;;  %p557_p9 = scmp.lt.u32.totalorder %s553_s19, %s819_s0 }
  0x18   :  { %p559_p10 = pnand %p557_p9, %p554_p8 }
  0x1a   :  { %562 = shalt.err (!%p559_p10)
}
  0x1b   :  { %s563_s24 = scalar_lea.vmem %s700_s27, 128  ;;  %p568_p12 = scmp.lt.s32.totalorder %s700_s27, %s700_s27 }
  0x1c   :  { %p564_p11 = scmp.ne.s32.totalorder %s700_s27, %s563_s24  ;;  %p569_p13 = scmp.lt.s32.totalorder %s563_s24, %s563_s24 }
  0x1e   :  { %p570_p0 = por %p569_p13, %p568_p12 }
  0x20   :  { %p571_p1 = pnand %p570_p0, %p564_p11 }
  0x22   :  { %574 = shalt.err (!%p571_p1)
}
  0x23   :  { %27 = dma.hbm_to_vmem [thread:$0]  %s819_s0, 128, %s700_s27, [#allocation3], %s651_s13, %s651_s13, %s652_s14  }
  0x24   :  { %s653_s26 = smov [#allocation7]   ;;  %s654_s29 = smov [#allocation8]  }
  0x25   :  { %s45_s28 = sshll.u32 %s653_s26, 4  ;;  %s57_s30 = sshll.u32 %s654_s29, 4  ;;  %s46_s28 = int_to_ptr.vmem [resolvable:$true] %s45_s28  ;;  %s737_s30 = int_to_ptr.vmem [resolvable:$true] %s57_s30 }
  0x26   :  { %s575_s10 = scalar_lea.hbm %s821_s2, 1024 }
  0x27   :  { %p576_p2 = scmp.ne.s32.totalorder %s821_s2, %s575_s10  ;;  %p579_p3 = scmp.lt.u32.totalorder %s575_s10, %s821_s2 }
  0x29   :  { %p581_p4 = pnand %p579_p3, %p576_p2 }
  0x2b   :  { %584 = shalt.err (!%p581_p4)
}
  0x2c   :  { %s585_s0 = scalar_lea.vmem %s46_s28, 1024  ;;  %p590_p6 = scmp.lt.s32.totalorder %s46_s28, %s46_s28 }
  0x2d   :  { %p586_p5 = scmp.ne.s32.totalorder %s46_s28, %s585_s0  ;;  %p591_p7 = scmp.lt.s32.totalorder %s585_s0, %s585_s0 }
  0x2f   :  { %p592_p8 = por %p591_p7, %p590_p6 }
  0x31   :  { %p593_p9 = pnand %p592_p8, %p586_p5 }
  0x33   :  { %596 = shalt.err (!%p593_p9)
}
  0x34   :  { %51 = dma.hbm_to_vmem [thread:$0]  %s821_s2, 1024, %s46_s28, [#allocation6], %s651_s13, %s651_s13, %s652_s14  }
  0x35   :  { %s597_s20 = scalar_lea.hbm %s822_s3, 1024 }
  0x36   :  { %p598_p10 = scmp.ne.s32.totalorder %s822_s3, %s597_s20  ;;  %p601_p11 = scmp.lt.u32.totalorder %s597_s20, %s822_s3 }
  0x38   :  { %p603_p12 = pnand %p601_p11, %p598_p10 }
  0x3a   :  { %606 = shalt.err (!%p603_p12)
}
  0x3b   :  { %s607_s1 = scalar_lea.vmem %s737_s30, 1024  ;;  %p612_p0 = scmp.lt.s32.totalorder %s737_s30, %s737_s30 }
  0x3c   :  { %p608_p13 = scmp.ne.s32.totalorder %s737_s30, %s607_s1  ;;  %p613_p1 = scmp.lt.s32.totalorder %s607_s1, %s607_s1 }
  0x3e   :  { %p614_p2 = por %p613_p1, %p612_p0 }
  0x40   :  { %p615_p3 = pnand %p614_p2, %p608_p13 }
  0x42   :  { %618 = shalt.err (!%p615_p3)
}
  0x43   :  { %63 = dma.hbm_to_vmem [thread:$0]  %s822_s3, 1024, %s737_s30, [#allocation9], %s651_s13, %s651_s13, %s652_s14  }
  0x44   :  { %641 = dma.done.wait [#allocation3], 128  }
  0x45   :  { %642 = vsyncadd [#allocation3], 4294967168 }
  0x46   :  { %643 = dma.done.wait [#allocation6], 1280  }
  0x47   :  { %644 = vsyncadd [#allocation6], 4294966016 }
  0x48   :  { %645 = dma.done.wait [#allocation9], 1024  }
  0x49   :  { %646 = vsyncadd [#allocation9], 4294966272  ;;  %v655_v0 = vmov 0.0   ;;  %vm656_vm0 = vmmov 0   ;;  %v512_v1 = vld [vmem:[#allocation5] sm:$0xff]   ;;  %v513_v2 = vld [vmem:[#allocation5 + $0x8] sm:$0xff]  }
  0x4a   :  { %453 = vmatprep.subr.bf16.mxu0 %v655_v0  ;;  %457 = vmatprep.mubr.msk.bf16.mxu0 %vm656_vm0, %v655_v0  ;;  %v515_v3 = vld [vmem:[#allocation7] sm:$0xff]   ;;  %v514_v4 = vld [vmem:[#allocation2] sm:$0xff]   ;;  %vm113_vm1 = vcmask 261120   ;;  %v517_v6 = vld [vmem:[#allocation7 + $0x10] sm:$0xff]   ;;  %s657_s29 = smov [#allocation10]  }
  0x4b   :  { %461 = vmatprep.subr.bf16.mxu1 %v655_v0  ;;  %477 = vmatprep.mubr.msk.bf16.mxu1 %vm656_vm0, %v655_v0  ;;  %v516_v5 = vld [vmem:[#allocation7 + $0x8] sm:$0xff]   ;;  %v518_v7 = vld [vmem:[#allocation7 + $0x18] sm:$0xff]   ;;  %v519_v8 = vld [vmem:[#allocation7 + $0x20] sm:$0xff]   ;;  %s395_s30 = sshll.u32 %s657_s29, 4  ;;  %s396_s30 = int_to_ptr.vmem [resolvable:$true] %s395_s30 }
  0x4c   :  { %454 = vmatpush3.bf16.msra.mxu0 %v512_v1  ;;  %462 = vmatpush3.bf16.msra.mxu1 %v515_v3  ;;  %v520_v9 = vld [vmem:[#allocation7 + $0x28] sm:$0xff]   ;;  %v521_v10 = vld [vmem:[#allocation7 + $0x30] sm:$0xff]   ;;  %v522_v11 = vld [vmem:[#allocation7 + $0x38] sm:$0xff]   ;;  %p624_p5 = scmp.lt.s32.totalorder %s396_s30, %s396_s30 }
  0x4d   :  { %455 = vmatprep.subr.bf16.mxu0 %v655_v0  ;;  %463 = vmatprep.subr.bf16.mxu1 %v655_v0  ;;  %v523_v12 = vld [vmem:[#allocation8] sm:$0xff]   ;;  %v524_v13 = vld [vmem:[#allocation8 + $0x8] sm:$0xff]   ;;  %v525_v14 = vld [vmem:[#allocation8 + $0x10] sm:$0xff]  }
  0x4e   :  { %v526_v15 = vld [vmem:[#allocation8 + $0x18] sm:$0xff]   ;;  %v527_v16 = vld [vmem:[#allocation8 + $0x20] sm:$0xff]   ;;  %v528_v17 = vld [vmem:[#allocation8 + $0x28] sm:$0xff]  }
  0x4f   :  { %v409_v18 = vld [vmem:[%s823_s4] ss:$0 sm:$0xff]  ;;  %v529_v28 = vld [vmem:[#allocation8 + $0x30] sm:$0xff]   ;;  %v530_v29 = vld [vmem:[#allocation8 + $0x38] sm:$0xff]  }
  0x50   :  { %456 = vmatpush3.bf16.msra.mxu0 %v513_v2  ;;  %464 = vmatpush3.bf16.msra.mxu1 %v516_v5  ;;  %v414_v30 = vld [vmem:[%s824_s5] ss:$0 sm:$0xff]  ;;  %s619_s5 = scalar_lea.vmem %s396_s30, 256 }
  0x51   :  { %481 = vmatprep.subr.bf16.mxu0 %v655_v0  ;;  %465 = vmatprep.subr.bf16.mxu1 %v655_v0  ;;  %v423_v40 = vld [vmem:[%s825_s6] ss:$0 sm:$0xff]  ;;  %p620_p4 = scmp.ne.s32.totalorder %s396_s30, %s619_s5  ;;  %p625_p6 = scmp.lt.s32.totalorder %s619_s5, %s619_s5 }
  0x53   :  { %458 = vmatmul.mubr.msk.bf16.vlgmr.msra.gmra.mrb[0].mxu0 %vm113_vm1, %v514_v4  ;;  %p626_p7 = por %p625_p6, %p624_p5 }
  0x54   :  { %497 = vmatprep.mubr.msk.bf16.mxu0 %vm656_vm0, %v655_v0  ;;  %466 = vmatpush3.bf16.msra.mxu1 %v517_v6 }
  0x55   :  { %467 = vmatprep.subr.bf16.mxu1 %v655_v0  ;;  %482 = vmatpush3.bf16.msra.mxu0 %v523_v12  ;;  %p627_p8 = pnand %p626_p7, %p620_p4 }
  0x56   :  { %483 = vmatprep.subr.bf16.mxu0 %v655_v0 }
  0x58   :  { %468 = vmatpush3.bf16.msra.mxu1 %v518_v7 }
  0x59   :  { %469 = vmatprep.subr.bf16.mxu1 %v655_v0  ;;  %484 = vmatpush3.bf16.msra.mxu0 %v524_v13 }
  0x5a   :  { %485 = vmatprep.subr.bf16.mxu0 %v655_v0 }
  0x5c   :  { %470 = vmatpush3.bf16.msra.mxu1 %v519_v8 }
  0x5d   :  { %471 = vmatprep.subr.bf16.mxu1 %v655_v0  ;;  %486 = vmatpush3.bf16.msra.mxu0 %v525_v14 }
  0x5e   :  { %487 = vmatprep.subr.bf16.mxu0 %v655_v0 }
  0x60   :  { %472 = vmatpush3.bf16.msra.mxu1 %v520_v9 }
  0x61   :  { %473 = vmatprep.subr.bf16.mxu1 %v655_v0  ;;  %488 = vmatpush3.bf16.msra.mxu0 %v526_v15 }
  0x62   :  { %489 = vmatprep.subr.bf16.mxu0 %v655_v0 }
  0x64   :  { %474 = vmatpush3.bf16.msra.mxu1 %v521_v10 }
  0x65   :  { %475 = vmatprep.subr.bf16.mxu1 %v655_v0  ;;  %490 = vmatpush3.bf16.msra.mxu0 %v527_v16 }
  0x66   :  { %491 = vmatprep.subr.bf16.mxu0 %v655_v0 }
  0x68   :  { %476 = vmatpush3.bf16.msra.mxu1 %v522_v11 }
  0x69   :  { %492 = vmatpush3.bf16.msra.mxu0 %v528_v17 }
  0x6a   :  { %493 = vmatprep.subr.bf16.mxu0 %v655_v0 }
  0x6d   :  { %494 = vmatpush3.bf16.msra.mxu0 %v529_v28 }
  0x6e   :  { %495 = vmatprep.subr.bf16.mxu0 %v655_v0 }
  0x71   :  { %496 = vmatpush3.bf16.msra.mxu0 %v530_v29 }
 0x126   :  { %v151_v19 = vpop.f32.mrb[0].mxu0 }
 0x127   :  { %v152_v20 = vadd.f32 %v409_v18, %v151_v19  ;;  %v459_v21 = vpop.f32.mrb[1].mxu0 }
 0x128   :  { %v154_v22 = vpop.f32.mrb[2].mxu0 }
 0x129   :  { %v155_v23 = vadd.f32 %v409_v18, %v154_v22  ;;  %v460_v24 = vpop.f32.mrb[3].mxu0  ;;  %v158_v25 = vmax.f32 %v152_v20, 0.0 }
 0x12b   :  { %v159_v26 = vmax.f32 %v155_v23, 0.0 }
 0x12d   :  { %v160_v27 = vpack.c.bf16 %v159_v26, %v158_v25 }
 0x12f   :  { %478 = vmatmul.mubr.bf16.vlgmr.msra.gmra.mrb[0].mxu1 %v160_v27 }
 0x202   :  { %v266_v31 = vpop.f32.mrb[0].mxu1 }
 0x203   :  { %v267_v32 = vadd.f32 %v414_v30, %v266_v31  ;;  %v479_v33 = vpop.f32.mrb[1].mxu1 }
 0x204   :  { %v269_v34 = vpop.f32.mrb[2].mxu1 }
 0x205   :  { %v270_v35 = vadd.f32 %v414_v30, %v269_v34  ;;  %v480_v36 = vpop.f32.mrb[3].mxu1  ;;  %v273_v37 = vmax.f32 %v267_v32, 0.0 }
 0x207   :  { %v274_v38 = vmax.f32 %v270_v35, 0.0 }
 0x209   :  { %v275_v39 = vpack.c.bf16 %v274_v38, %v273_v37 }
 0x20b   :  { %498 = vmatmul.mubr.bf16.vlgmr.msra.gmra.mrb[4].mxu0 %v275_v39 }
 0x2de   :  { %v381_v41 = vpop.f32.mrb[4].mxu0 }
 0x2df   :  { %v382_v42 = vadd.f32 %v423_v40, %v381_v41  ;;  %v499_v43 = vpop.f32.mrb[5].mxu0 }
 0x2e0   :  { %v384_v44 = vpop.f32.mrb[6].mxu0 }
 0x2e1   :  { %388 = vst [vmem:[#allocation10] sm:$0xff] %v382_v42  ;;  %v385_v45 = vadd.f32 %v423_v40, %v384_v44  ;;  %v500_v46 = vpop.f32.mrb[7].mxu0 }
 0x2e3   :  { %389 = vst [vmem:[#allocation10 + $0x8] sm:$0xff] %v385_v45 }
 0x2e4   :  { %630 = shalt.err (!%p627_p8)
}
 0x2e5   :  { %s631_s9 = scalar_lea.hbm %s826_s7, 256 }
 0x2e6   :  { %p632_p9 = scmp.ne.s32.totalorder %s826_s7, %s631_s9  ;;  %p635_p10 = scmp.lt.u32.totalorder %s631_s9, %s826_s7 }
 0x2e8   :  { %p637_p11 = pnand %p635_p10, %p632_p9 }
 0x2ea   :  { %640 = shalt.err (!%p637_p11)
}
 0x2eb   :  { %s658_s16 = smov 128   ;;  %s659_s0 = smov 8  }
 0x2ec   :  { %401 = dma.vmem_to_hbm [thread:$0]  %s396_s30, 256, %s826_s7, [#allocation4], %s658_s16, %s658_s16, %s659_s0  }
 0x2ed   :  { %647 = dma.done.wait [#allocation4], 256  }
 0x2ee   :  { %648 = vsyncadd [#allocation4], 4294967040 }
 0x2ef   :  { %405 = vsyncpa [#allocation3], 1 }
 0x2f0   :  { %406 = vsyncpa [#allocation6], 1 }
 0x2f1   :  { %407 = vsyncpa [#allocation9], 1 }
 0x2f2   :  { %408 = vsyncpa [#allocation4], 1 }

// kernel: tpu_custom_call.1
= control target key start
LH: loop header
LB: loop body
LE: loop exit
PB: predicated region body
PF: predicated region fallthrough
CT: control target
= control target key end

     0   :  { %12 = vsyncpa [#allocation3], 0  ;;  %s819_s0 = inlined_call_operand.hbm [shape: bf16[16,32], index: 0, kind: input, shape index: {}]   ;;  %s820_s1 = inlined_call_operand.hbm [shape: bf16[32,128], index: 1, kind: input, shape index: {}]   ;;  %s821_s2 = inlined_call_operand.hbm [shape: bf16[128,128], index: 2, kind: input, shape index: {}]   ;;  %s822_s3 = inlined_call_operand.hbm [shape: bf16[128,128], index: 3, kind: input, shape index: {}]   ;;  %s823_s4 = inlined_call_operand.vmem [shape: f32[1,128], index: 4, kind: input, shape index: {}]   ;;  %s824_s5 = inlined_call_operand.vmem [shape: f32[1,128], index: 5, kind: input, shape index: {}]   ;;  %s825_s6 = inlined_call_operand.vmem [shape: f32[1,128], index: 6, kind: input, shape index: {}]   ;;  %s826_s7 = inlined_call_operand.hbm [shape: f32[16,128], index: 7, kind: output, shape index: {}]  }
   0x1   :  { %13 = vsyncpa [#allocation6], 0 }
   0x2   :  { %14 = vsyncpa [#allocation9], 0 }
   0x3   :  { %15 = vsyncpa [#allocation4], 0  ;;  %s649_s24 = smov [#allocation5]   ;;  %s650_s26 = smov [#allocation2]  }
   0x4   :  { %s33_s25 = sshll.u32 %s649_s24, 4  ;;  %s21_s27 = sshll.u32 %s650_s26, 4  ;;  %s34_s25 = int_to_ptr.vmem [resolvable:$true] %s33_s25  ;;  %s700_s27 = int_to_ptr.vmem [resolvable:$true] %s21_s27 }
   0x5   :  { %s531_s30 = scalar_lea.hbm %s820_s1, 256 }
   0x6   :  { %p532_p0 = scmp.ne.s32.totalorder %s820_s1, %s531_s30  ;;  %p535_p1 = scmp.lt.u32.totalorder %s531_s30, %s820_s1 }
   0x8   :  { %p537_p2 = pnand %p535_p1, %p532_p0 }
   0xa   :  { %540 = shalt.err (!%p537_p2)
}
   0xb   :  { %s541_s12 = scalar_lea.vmem %s34_s25, 256  ;;  %p546_p4 = scmp.lt.s32.totalorder %s34_s25, %s34_s25 }
   0xc   :  { %p542_p3 = scmp.ne.s32.totalorder %s34_s25, %s541_s12  ;;  %p547_p5 = scmp.lt.s32.totalorder %s541_s12, %s541_s12 }
   0xe   :  { %p548_p6 = por %p547_p5, %p546_p4 }
  0x10   :  { %p549_p7 = pnand %p548_p6, %p542_p3 }
  0x12   :  { %552 = shalt.err (!%p549_p7)
}
  0x13   :  { %s651_s13 = smov 64   ;;  %s652_s14 = smov 4  }
  0x14   :  { %39 = dma.hbm_to_vmem [thread:$0]  %s820_s1, 256, %s34_s25, [#allocation6], %s651_s13, %s651_s13, %s652_s14  }
  0x15   :  { %s553_s19 = scalar_lea.hbm %s819_s0, 128 }
  0x16   :  { %p554_p8 = scmp.ne.s32.totalorder %s819_s0, %s553_s19  ;;  %p557_p9 = scmp.lt.u32.totalorder %s553_s19, %s819_s0 }
  0x18   :  { %p559_p10 = pnand %p557_p9, %p554_p8 }
  0x1a   :  { %562 = shalt.err (!%p559_p10)
}
  0x1b   :  { %s563_s24 = scalar_lea.vmem %s700_s27, 128  ;;  %p568_p12 = scmp.lt.s32.totalorder %s700_s27, %s700_s27 }
  0x1c   :  { %p564_p11 = scmp.ne.s32.totalorder %s700_s27, %s563_s24  ;;  %p569_p13 = scmp.lt.s32.totalorder %s563_s24, %s563_s24 }
  0x1e   :  { %p570_p0 = por %p569_p13, %p568_p12 }
  0x20   :  { %p571_p1 = pnand %p570_p0, %p564_p11 }
  0x22   :  { %574 = shalt.err (!%p571_p1)
}
  0x23   :  { %27 = dma.hbm_to_vmem [thread:$0]  %s819_s0, 128, %s700_s27, [#allocation3], %s651_s13, %s651_s13, %s652_s14  }
  0x24   :  { %s653_s26 = smov [#allocation7]   ;;  %s654_s29 = smov [#allocation8]  }
  0x25   :  { %s45_s28 = sshll.u32 %s653_s26, 4  ;;  %s57_s30 = sshll.u32 %s654_s29, 4  ;;  %s46_s28 = int_to_ptr.vmem [resolvable:$true] %s45_s28  ;;  %s737_s30 = int_to_ptr.vmem [resolvable:$true] %s57_s30 }
  0x26   :  { %s575_s10 = scalar_lea.hbm %s821_s2, 1024 }
  0x27   :  { %p576_p2 = scmp.ne.s32.totalorder %s821_s2, %s575_s10  ;;  %p579_p3 = scmp.lt.u32.totalorder %s575_s10, %s821_s2 }
  0x29   :  { %p581_p4 = pnand %p579_p3, %p576_p2 }
  0x2b   :  { %584 = shalt.err (!%p581_p4)
}
  0x2c   :  { %s585_s0 = scalar_lea.vmem %s46_s28, 1024  ;;  %p590_p6 = scmp.lt.s32.totalorder %s46_s28, %s46_s28 }
  0x2d   :  { %p586_p5 = scmp.ne.s32.totalorder %s46_s28, %s585_s0  ;;  %p591_p7 = scmp.lt.s32.totalorder %s585_s0, %s585_s0 }
  0x2f   :  { %p592_p8 = por %p591_p7, %p590_p6 }
  0x31   :  { %p593_p9 = pnand %p592_p8, %p586_p5 }
  0x33   :  { %596 = shalt.err (!%p593_p9)
}
  0x34   :  { %51 = dma.hbm_to_vmem [thread:$0]  %s821_s2, 1024, %s46_s28, [#allocation6], %s651_s13, %s651_s13, %s652_s14  }
  0x35   :  { %s597_s20 = scalar_lea.hbm %s822_s3, 1024 }
  0x36   :  { %p598_p10 = scmp.ne.s32.totalorder %s822_s3, %s597_s20  ;;  %p601_p11 = scmp.lt.u32.totalorder %s597_s20, %s822_s3 }
  0x38   :  { %p603_p12 = pnand %p601_p11, %p598_p10 }
  0x3a   :  { %606 = shalt.err (!%p603_p12)
}
  0x3b   :  { %s607_s1 = scalar_lea.vmem %s737_s30, 1024  ;;  %p612_p0 = scmp.lt.s32.totalorder %s737_s30, %s737_s30 }
  0x3c   :  { %p608_p13 = scmp.ne.s32.totalorder %s737_s30, %s607_s1  ;;  %p613_p1 = scmp.lt.s32.totalorder %s607_s1, %s607_s1 }
  0x3e   :  { %p614_p2 = por %p613_p1, %p612_p0 }
  0x40   :  { %p615_p3 = pnand %p614_p2, %p608_p13 }
  0x42   :  { %618 = shalt.err (!%p615_p3)
}
  0x43   :  { %63 = dma.hbm_to_vmem [thread:$0]  %s822_s3, 1024, %s737_s30, [#allocation9], %s651_s13, %s651_s13, %s652_s14  }
  0x44   :  { %641 = dma.done.wait [#allocation3], 128  }
  0x45   :  { %642 = vsyncadd [#allocation3], 4294967168 }
  0x46   :  { %643 = dma.done.wait [#allocation6], 1280  }
  0x47   :  { %644 = vsyncadd [#allocation6], 4294966016 }
  0x48   :  { %645 = dma.done.wait [#allocation9], 1024  }
  0x49   :  { %646 = vsyncadd [#allocation9], 4294966272  ;;  %v655_v0 = vmov 0.0   ;;  %vm656_vm0 = vmmov 0   ;;  %v512_v1 = vld [vmem:[#allocation5] sm:$0xff]   ;;  %v513_v2 = vld [vmem:[#allocation5 + $0x8] sm:$0xff]  }
  0x4a   :  { %453 = vmatprep.subr.bf16.mxu0 %v655_v0  ;;  %457 = vmatprep.mubr.msk.bf16.mxu0 %vm656_vm0, %v655_v0  ;;  %v515_v3 = vld [vmem:[#allocation7] sm:$0xff]   ;;  %v514_v4 = vld [vmem:[#allocation2] sm:$0xff]   ;;  %vm113_vm1 = vcmask 261120   ;;  %v517_v6 = vld [vmem:[#allocation7 + $0x10] sm:$0xff]   ;;  %s657_s29 = smov [#allocation10]  }
  0x4b   :  { %461 = vmatprep.subr.bf16.mxu1 %v655_v0  ;;  %477 = vmatprep.mubr.msk.bf16.mxu1 %vm656_vm0, %v655_v0  ;;  %v516_v5 = vld [vmem:[#allocation7 + $0x8] sm:$0xff]   ;;  %v518_v7 = vld [vmem:[#allocation7 + $0x18] sm:$0xff]   ;;  %v519_v8 = vld [vmem:[#allocation7 + $0x20] sm:$0xff]   ;;  %s395_s30 = sshll.u32 %s657_s29, 4  ;;  %s396_s30 = int_to_ptr.vmem [resolvable:$true] %s395_s30 }
  0x4c   :  { %454 = vmatpush3.bf16.msra.mxu0 %v512_v1  ;;  %462 = vmatpush3.bf16.msra.mxu1 %v515_v3  ;;  %v520_v9 = vld [vmem:[#allocation7 + $0x28] sm:$0xff]   ;;  %v521_v10 = vld [vmem:[#allocation7 + $0x30] sm:$0xff]   ;;  %v522_v11 = vld [vmem:[#allocation7 + $0x38] sm:$0xff]   ;;  %p624_p5 = scmp.lt.s32.totalorder %s396_s30, %s396_s30 }
  0x4d   :  { %455 = vmatprep.subr.bf16.mxu0 %v655_v0  ;;  %463 = vmatprep.subr.bf16.mxu1 %v655_v0  ;;  %v523_v12 = vld [vmem:[#allocation8] sm:$0xff]   ;;  %v524_v13 = vld [vmem:[#allocation8 + $0x8] sm:$0xff]   ;;  %v525_v14 = vld [vmem:[#allocation8 + $0x10] sm:$0xff]  }
  0x4e   :  { %v526_v15 = vld [vmem:[#allocation8 + $0x18] sm:$0xff]   ;;  %v527_v16 = vld [vmem:[#allocation8 + $0x20] sm:$0xff]   ;;  %v528_v17 = vld [vmem:[#allocation8 + $0x28] sm:$0xff]  }
  0x4f   :  { %v409_v18 = vld [vmem:[%s823_s4] ss:$0 sm:$0xff]  ;;  %v529_v28 = vld [vmem:[#allocation8 + $0x30] sm:$0xff]   ;;  %v530_v29 = vld [vmem:[#allocation8 + $0x38] sm:$0xff]  }
  0x50   :  { %456 = vmatpush3.bf16.msra.mxu0 %v513_v2  ;;  %464 = vmatpush3.bf16.msra.mxu1 %v516_v5  ;;  %v414_v30 = vld [vmem:[%s824_s5] ss:$0 sm:$0xff]  ;;  %s619_s5 = scalar_lea.vmem %s396_s30, 256 }
  0x51   :  { %481 = vmatprep.subr.bf16.mxu0 %v655_v0  ;;  %465 = vmatprep.subr.bf16.mxu1 %v655_v0  ;;  %v423_v40 = vld [vmem:[%s825_s6] ss:$0 sm:$0xff]  ;;  %p620_p4 = scmp.ne.s32.totalorder %s396_s30, %s619_s5  ;;  %p625_p6 = scmp.lt.s32.totalorder %s619_s5, %s619_s5 }
  0x53   :  { %458 = vmatmul.mubr.msk.bf16.vlgmr.msra.gmra.mrb[0].mxu0 %vm113_vm1, %v514_v4  ;;  %p626_p7 = por %p625_p6, %p624_p5 }
  0x54   :  { %497 = vmatprep.mubr.msk.bf16.mxu0 %vm656_vm0, %v655_v0  ;;  %466 = vmatpush3.bf16.msra.mxu1 %v517_v6 }
  0x55   :  { %467 = vmatprep.subr.bf16.mxu1 %v655_v0  ;;  %482 = vmatpush3.bf16.msra.mxu0 %v523_v12  ;;  %p627_p8 = pnand %p626_p7, %p620_p4 }
  0x56   :  { %483 = vmatprep.subr.bf16.mxu0 %v655_v0 }
  0x58   :  { %468 = vmatpush3.bf16.msra.mxu1 %v518_v7 }
  0x59   :  { %469 = vmatprep.subr.bf16.mxu1 %v655_v0  ;;  %484 = vmatpush3.bf16.msra.mxu0 %v524_v13 }
  0x5a   :  { %485 = vmatprep.subr.bf16.mxu0 %v655_v0 }
  0x5c   :  { %470 = vmatpush3.bf16.msra.mxu1 %v519_v8 }
  0x5d   :  { %471 = vmatprep.subr.bf16.mxu1 %v655_v0  ;;  %486 = vmatpush3.bf16.msra.mxu0 %v525_v14 }
  0x5e   :  { %487 = vmatprep.subr.bf16.mxu0 %v655_v0 }
  0x60   :  { %472 = vmatpush3.bf16.msra.mxu1 %v520_v9 }
  0x61   :  { %473 = vmatprep.subr.bf16.mxu1 %v655_v0  ;;  %488 = vmatpush3.bf16.msra.mxu0 %v526_v15 }
  0x62   :  { %489 = vmatprep.subr.bf16.mxu0 %v655_v0 }
  0x64   :  { %474 = vmatpush3.bf16.msra.mxu1 %v521_v10 }
  0x65   :  { %475 = vmatprep.subr.bf16.mxu1 %v655_v0  ;;  %490 = vmatpush3.bf16.msra.mxu0 %v527_v16 }
  0x66   :  { %491 = vmatprep.subr.bf16.mxu0 %v655_v0 }
  0x68   :  { %476 = vmatpush3.bf16.msra.mxu1 %v522_v11 }
  0x69   :  { %492 = vmatpush3.bf16.msra.mxu0 %v528_v17 }
  0x6a   :  { %493 = vmatprep.subr.bf16.mxu0 %v655_v0 }
  0x6d   :  { %494 = vmatpush3.bf16.msra.mxu0 %v529_v28 }
  0x6e   :  { %495 = vmatprep.subr.bf16.mxu0 %v655_v0 }
  0x71   :  { %496 = vmatpush3.bf16.msra.mxu0 %v530_v29 }
 0x126   :  { %v151_v19 = vpop.f32.mrb[0].mxu0 }
 0x127   :  { %v152_v20 = vadd.f32 %v409_v18, %v151_v19  ;;  %v459_v21 = vpop.f32.mrb[1].mxu0 }
 0x128   :  { %v154_v22 = vpop.f32.mrb[2].mxu0 }
 0x129   :  { %v155_v23 = vadd.f32 %v409_v18, %v154_v22  ;;  %v460_v24 = vpop.f32.mrb[3].mxu0  ;;  %v158_v25 = vmax.f32 %v152_v20, 0.0 }
 0x12b   :  { %v159_v26 = vmax.f32 %v155_v23, 0.0 }
 0x12d   :  { %v160_v27 = vpack.c.bf16 %v159_v26, %v158_v25 }
 0x12f   :  { %478 = vmatmul.mubr.bf16.vlgmr.msra.gmra.mrb[0].mxu1 %v160_v27 }
 0x202   :  { %v266_v31 = vpop.f32.mrb[0].mxu1 }
 0x203   :  { %v267_v32 = vadd.f32 %v414_v30, %v266_v31  ;;  %v479_v33 = vpop.f32.mrb[1].mxu1 }
 0x204   :  { %v269_v34 = vpop.f32.mrb[2].mxu1 }
 0x205   :  { %v270_v35 = vadd.f32 %v414_v30, %v269_v34  ;;  %v480_v36 = vpop.f32.mrb[3].mxu1  ;;  %v273_v37 = vmax.f32 %v267_v32, 0.0 }
 0x207   :  { %v274_v38 = vmax.f32 %v270_v35, 0.0 }
 0x209   :  { %v275_v39 = vpack.c.bf16 %v274_v38, %v273_v37 }
 0x20b   :  { %498 = vmatmul.mubr.bf16.vlgmr.msra.gmra.mrb[4].mxu0 %v275_v39 }
 0x2de   :  { %v381_v41 = vpop.f32.mrb[4].mxu0 }
 0x2df   :  { %v382_v42 = vadd.f32 %v423_v40, %v381_v41  ;;  %v499_v43 = vpop.f32.mrb[5].mxu0 }
 0x2e0   :  { %v384_v44 = vpop.f32.mrb[6].mxu0 }
 0x2e1   :  { %388 = vst [vmem:[#allocation10] sm:$0xff] %v382_v42  ;;  %v385_v45 = vadd.f32 %v423_v40, %v384_v44  ;;  %v500_v46 = vpop.f32.mrb[7].mxu0 }
 0x2e3   :  { %389 = vst [vmem:[#allocation10 + $0x8] sm:$0xff] %v385_v45 }
 0x2e4   :  { %630 = shalt.err (!%p627_p8)
}
 0x2e5   :  { %s631_s9 = scalar_lea.hbm %s826_s7, 256 }
 0x2e6   :  { %p632_p9 = scmp.ne.s32.totalorder %s826_s7, %s631_s9  ;;  %p635_p10 = scmp.lt.u32.totalorder %s631_s9, %s826_s7 }
 0x2e8   :  { %p637_p11 = pnand %p635_p10, %p632_p9 }
 0x2ea   :  { %640 = shalt.err (!%p637_p11)
}
 0x2eb   :  { %s658_s16 = smov 128   ;;  %s659_s0 = smov 8  }
 0x2ec   :  { %401 = dma.vmem_to_hbm [thread:$0]  %s396_s30, 256, %s826_s7, [#allocation4], %s658_s16, %s658_s16, %s659_s0  }
 0x2ed   :  { %647 = dma.done.wait [#allocation4], 256  }
 0x2ee   :  { %648 = vsyncadd [#allocation4], 4294967040 }
 0x2ef   :  { %405 = vsyncpa [#allocation3], 1 }
 0x2f0   :  { %406 = vsyncpa [#allocation6], 1 }
 0x2f1   :  { %407 = vsyncpa [#allocation9], 1 }
 0x2f2   :  { %408 = vsyncpa [#allocation4], 1 }

</bundles_post_ra>
